<compile_context>
chip_gen: v7x
topology: tpu7x:2x2x1
jax: 0.10.0
libtpu: 0.0.40
codegen_flags: <defaults>
</compile_context>

<pallas_src>
import functools

import numpy as np
import jax
import jax.numpy as jnp
from jax import lax
from jax.experimental import pallas as pl
from jax.experimental.pallas import tpu as pltpu


# ----------------------------- STFT setup (glue) -----------------------------

def _hann_periodic(win_length):
    n = np.arange(win_length)
    return 0.5 - 0.5 * np.cos(2.0 * np.pi * n / win_length)


def make_stft_bases(filter_length, hop_length, win_length, c_pad):
    """Fused, lane-padded forward/inverse Fourier bases (tacotron2/waveglow STFT).

    Returns:
      fwd_fused: (FL, 2*c_pad)  columns [0:C]=re basis, [c_pad:c_pad+C]=im basis, rest 0
      inv_fused: (2*c_pad, FL)  rows    [0:C]=re basis, [c_pad:c_pad+C]=im basis, rest 0
      win:       (FL,) centered hann window
    """
    cutoff = filter_length // 2 + 1
    assert cutoff <= c_pad
    fourier = np.fft.fft(np.eye(filter_length))
    fb = np.vstack([np.real(fourier[:cutoff]),
                    np.imag(fourier[:cutoff])])                 # (2C, FL)
    scale = filter_length / hop_length
    inv = np.linalg.pinv(scale * fb).T                          # (2C, FL)

    win = _hann_periodic(win_length)
    pad = filter_length - win_length
    win = np.pad(win, (pad // 2, pad - pad // 2))               # center-pad to FL

    fwd = fb * win[None, :]
    inv = inv * win[None, :]

    fwd_fused = np.zeros((filter_length, 2 * c_pad), np.float32)
    fwd_fused[:, :cutoff] = fwd[:cutoff].T                      # re
    fwd_fused[:, c_pad:c_pad + cutoff] = fwd[cutoff:].T         # im

    inv_fused = np.zeros((2 * c_pad, filter_length), np.float32)
    inv_fused[:cutoff] = inv[:cutoff]                           # re
    inv_fused[c_pad:c_pad + cutoff] = inv[cutoff:]              # im
    return fwd_fused, inv_fused, win.astype(np.float32)


def window_sumsquare(win, n_frames, hop_length, filter_length):
    n = filter_length + hop_length * (n_frames - 1)
    x = np.zeros(n, dtype=np.float32)
    win_sq = (win.astype(np.float32)) ** 2
    for i in range(n_frames):
        s = i * hop_length
        x[s:min(n, s + filter_length)] += win_sq[:max(0, min(filter_length, n - s))]
    return x


def frame_audio(audio, filter_length, hop_length):
    """Reflect-pad like torch.nn.functional.pad(mode='reflect') and frame."""
    B, S = audio.shape
    padded = jnp.pad(audio, ((0, 0), (filter_length // 2, filter_length // 2)),
                     mode="reflect")
    T = S // hop_length + 1
    idx = jnp.arange(T)[:, None] * hop_length + jnp.arange(filter_length)[None, :]
    frames = padded[:, idx]                                     # (B, T, FL)
    return frames.reshape(B * T, filter_length), T


def _round_up(x, m):
    return (x + m - 1) // m * m


def _choose_tile_rows(BT, max_tile=1024):
    """Biggest row-tile <= max_tile that still yields >= 2 grid steps (v7x 2-TC
    sharding of the 'parallel' axis); rows kept a multiple of 8 (sublane)."""
    tile = min(max_tile, _round_up((BT + 1) // 2, 8))
    return max(tile, 8)


# ------------------------------- Pallas kernel --------------------------------

def _denoise_kernel(frames_ref, fwd_ref, bias_ref, inv_ref, out_ref, *, c_pad):
    # Forward STFT: one fused MXU matmul -> [re | im] spectral block, f32 accumulate.
    spec = jnp.dot(frames_ref[...], fwd_ref[...],
                   preferred_element_type=jnp.float32)           # (TM, 2*c_pad) f32
    # |spec|^2 per frequency, replicated into both re and im halves via a lane roll
    # of c_pad (XLU slot, essentially free).
    sq = spec * spec
    mag_sq = sq + pltpu.roll(sq, c_pad, 1)
    # gain = max(1 - (strength*bias)/|spec|, 0) == clamp(|spec| - strength*bias, 0)/|spec|
    # The 1e-12 eps inside rsqrt only kicks in when |spec|~0, where spec (and hence the
    # output contribution) is ~0 anyway, so semantics match the torch clamp/divide form.
    inv_mag = lax.rsqrt(mag_sq + 1e-12)                          # EUP slot
    gain = jnp.maximum(1.0 - bias_ref[...] * inv_mag, 0.0)
    spec_d = spec * gain
    # Inverse STFT (per-frame conv_transpose1d contribution): one fused MXU matmul.
    out_ref[...] = jnp.dot(spec_d.astype(inv_ref.dtype), inv_ref[...],
                           preferred_element_type=jnp.float32)   # (TM, FL) f32


def denoiser_forward(audio, bias_fused_scaled, fwd_basis, inv_basis, win,
                     filter_length, hop_length, c_pad,
                     tile_rows=None, matmul_dtype=jnp.bfloat16):
    """Full denoiser forward.

    matmul_dtype defaults to bf16 (bf16-native MXUs on v5e/v6e/v7x; ~1e-3 relative
    error vs the f32 torch reference).  Pass jnp.float32 for reference numerics.
    """
    B, S = audio.shape
    FL = filter_length

    # TODO(synk): long-audio path — keep the reflect-padded waveform in HBM
    # (memory_space=pl.ANY), DMA a contiguous (tile_rows*hop + FL - hop)-sample
    # window per tile and build the frame tile in-kernel to cut input HBM bytes ~4x.
    frames, T = frame_audio(audio.astype(jnp.float32), FL, hop_length)
    BT = B * T
    if tile_rows is None:
        tile_rows = _choose_tile_rows(BT)
    BT_pad = pl.cdiv(BT, tile_rows) * tile_rows
    frames = jnp.pad(frames, ((0, BT_pad - BT), (0, 0))).astype(matmul_dtype)

    fwd = fwd_basis.astype(matmul_dtype)
    inv = inv_basis.astype(matmul_dtype)
    bias = bias_fused_scaled.reshape(1, 2 * c_pad).astype(jnp.float32)

    kernel = functools.partial(_denoise_kernel, c_pad=c_pad)
    out_frames = pl.pallas_call(
        kernel,
        out_shape=jax.ShapeDtypeStruct((BT_pad, FL), jnp.float32),
        grid=(BT_pad // tile_rows,),
        in_specs=[
            pl.BlockSpec((tile_rows, FL), lambda i: (i, 0)),     # frames tile
            pl.BlockSpec((FL, 2 * c_pad), lambda i: (0, 0)),     # fused forward basis
            pl.BlockSpec((1, 2 * c_pad), lambda i: (0, 0)),      # strength * bias spectrum
            pl.BlockSpec((2 * c_pad, FL), lambda i: (0, 0)),     # fused inverse basis
        ],
        out_specs=pl.BlockSpec((tile_rows, FL), lambda i: (i, 0)),
        compiler_params=pltpu.CompilerParams(
            dimension_semantics=("parallel",)),
    )(frames, fwd, bias, inv)

    out_frames = out_frames[:BT].reshape(B, T, FL)

    # Overlap-add (== conv_transpose1d with stride=hop).  Single fused XLA pass:
    # pad each of the k shifted contributions along the frame axis and sum, instead
    # of k sequential dynamic-update-slice adds.
    k = FL // hop_length
    fr = out_frames.reshape(B, T, k, hop_length)
    shifted = jnp.stack(
        [jnp.pad(fr[:, :, j, :], ((0, 0), (j, k - 1 - j), (0, 0))) for j in range(k)],
        axis=0)                                                  # (k, B, T+k-1, hop)
    inv_sig = shifted.sum(axis=0).reshape(B, (T + k - 1) * hop_length)

    # Window-sum-square normalization + hop-ratio scale folded into ONE constant
    # vector multiply (same semantics as the librosa-style masked divide).
    wss = window_sumsquare(win, T, hop_length, FL)
    tiny = np.finfo(np.float32).tiny
    hop_scale = float(FL) / hop_length
    norm = np.where(wss > tiny, hop_scale / wss, hop_scale).astype(np.float32)
    inv_sig = inv_sig * jnp.asarray(norm)[None, :]

    # Remove the reflect-padding contribution (FL/2 on each side).
    inv_sig = inv_sig[:, FL // 2: -(FL // 2)]
    return inv_sig[:, None, :]                                   # (B, 1, S), like torch


# ------------------------------ bias_spec setup -------------------------------

def compute_bias_spec(fwd_fused, c_pad, filter_length, hop_length, key):
    # TODO(synk): no HiFi-GAN checkpoint is available; the hifigan(zeros-mel)
    # bias waveform is replaced by a deterministic synthetic waveform with the
    # same role (only frame 0 of its magnitude spectrum is used, as in torch).
    bias_audio = 0.01 * jax.random.normal(key, (1, 88 * hop_length), dtype=jnp.float32)
    frames, _ = frame_audio(bias_audio, filter_length, hop_length)
    spec = jnp.dot(frames, fwd_fused,
                   precision=lax.Precision.HIGHEST)              # (T, 2*c_pad), f32 MXU
    re, im = spec[:, :c_pad], spec[:, c_pad:]
    mag = jnp.sqrt(re * re + im * im)
    return mag[0]                                                # (c_pad,)  == bias_spec[:, :, 0]


# ----------------------------------- main --------------------------------------

if __name__ == "__main__":
    FILTER_LENGTH = 256
    N_OVERLAP = 4
    HOP = FILTER_LENGTH // N_OVERLAP
    WIN_LENGTH = 256
    CUT = FILTER_LENGTH // 2 + 1            # 129
    C_PAD = 192                             # 129 -> 192 per half; 2*C_PAD = 384 lanes (3x128)
    B, S = 2, 1024
    STRENGTH = 0.1

    fwd_np, inv_np, win = make_stft_bases(FILTER_LENGTH, HOP, WIN_LENGTH, C_PAD)
    fwd_j, inv_j = jnp.asarray(fwd_np), jnp.asarray(inv_np)

    key = jax.random.PRNGKey(0)
    k_audio, k_bias = jax.random.split(key)
    audio = jax.random.normal(k_audio, (B, S), dtype=jnp.float32)

    bias_mag = compute_bias_spec(fwd_j, C_PAD, FILTER_LENGTH, HOP, k_bias)   # (C_PAD,)
    # Fold strength in host-side and tile across the [re | im] halves.
    bias_fused_scaled = STRENGTH * jnp.concatenate([bias_mag, bias_mag])     # (2*C_PAD,)

    # Default bf16-MXU path (production) and f32 path (numerics reference).
    out = denoiser_forward(audio, bias_fused_scaled, fwd_j, inv_j,
                           win, FILTER_LENGTH, HOP, C_PAD)
    out_f32 = denoiser_forward(audio, bias_fused_scaled, fwd_j, inv_j,
                               win, FILTER_LENGTH, HOP, C_PAD,
                               matmul_dtype=jnp.float32)
    out, out_f32 = jax.block_until_ready((out, out_f32))

    assert out.shape == (B, 1, S), out.shape
    assert bool(jnp.all(jnp.isfinite(out)))
    assert bool(jnp.all(jnp.isfinite(out_f32)))
    rel = jnp.linalg.norm(out - out_f32) / (jnp.linalg.norm(out_f32) + 1e-12)
    assert float(rel) < 5e-2, float(rel)      # bf16 vs f32 MXU path: ~1e-3 expected
    print("KERNEL_OK")
</pallas_src>

<mosaic_0001>
module attributes {stable_mosaic.version = 11 : i64} {
  func.func @_denoise_kernel(%arg0: i32, %arg1: memref<24x256xbf16, #tpu.memory_space<vmem>>, %arg2: memref<256x384xbf16, #tpu.memory_space<vmem>>, %arg3: memref<1x384xf32, #tpu.memory_space<vmem>>, %arg4: memref<384x256xbf16, #tpu.memory_space<vmem>>, %arg5: memref<24x256xf32, #tpu.memory_space<vmem>>) attributes {dimension_semantics = [#tpu.dimension_semantics<parallel>], iteration_bounds = array<i64: 2>, scalar_prefetch = 0 : i64, scratch_operands = 0 : i64, tpu.core_type = #tpu.core_type<tc>, window_params = [{transform_indices = @transform_0, window_bounds = array<i64: 24, 256>}, {pipeline_mode = #tpu.pipeline_mode<synchronous>, transform_indices = @transform_1, window_bounds = array<i64: 256, 384>}, {pipeline_mode = #tpu.pipeline_mode<synchronous>, transform_indices = @transform_2, window_bounds = array<i64: 1, 384>}, {pipeline_mode = #tpu.pipeline_mode<synchronous>, transform_indices = @transform_3, window_bounds = array<i64: 384, 256>}, {transform_indices = @transform_4, window_bounds = array<i64: 24, 256>}]} {
    %c0 = arith.constant 0 : index
    %c0_0 = arith.constant 0 : index
    %0 = vector.load %arg1[%c0, %c0_0] : memref<24x256xbf16, #tpu.memory_space<vmem>>, vector<24x256xbf16>
    %c0_1 = arith.constant 0 : index
    %c0_2 = arith.constant 0 : index
    %1 = vector.load %arg2[%c0_1, %c0_2] : memref<256x384xbf16, #tpu.memory_space<vmem>>, vector<256x384xbf16>
    %cst = arith.constant dense<0.000000e+00> : vector<24x384xf32>
    %2 = tpu.matmul %0, %1, %cst {dimension_numbers = #tpu.dot_dimension_numbers<[1], [0], [0], [1], [0, 0, 1, 1], [], []>} : vector<24x256xbf16>, vector<256x384xbf16>, vector<24x384xf32> -> vector<24x384xf32>
    %3 = arith.mulf %2, %2 : vector<24x384xf32>
    %c192_i32 = arith.constant 192 : i32
    %4 = tpu.dynamic_rotate %3 by %c192_i32 dim 1 : vector<24x384xf32>, i32 -> vector<24x384xf32>
    %5 = arith.addf %3, %4 : vector<24x384xf32>
    %cst_3 = arith.constant 9.99999996E-13 : f32
    %6 = vector.broadcast %cst_3 : f32 to vector<24x384xf32>
    %7 = arith.addf %5, %6 : vector<24x384xf32>
    %8 = math.rsqrt %7 : vector<24x384xf32>
    %c0_4 = arith.constant 0 : index
    %c0_5 = arith.constant 0 : index
    %9 = vector.load %arg3[%c0_4, %c0_5] : memref<1x384xf32, #tpu.memory_space<vmem>>, vector<1x384xf32>
    %10 = vector.broadcast %9 : vector<1x384xf32> to vector<24x384xf32>
    %11 = arith.mulf %10, %8 : vector<24x384xf32>
    %cst_6 = arith.constant 1.000000e+00 : f32
    %12 = vector.broadcast %cst_6 : f32 to vector<24x384xf32>
    %13 = arith.subf %12, %11 : vector<24x384xf32>
    %cst_7 = arith.constant 0.000000e+00 : f32
    %14 = vector.broadcast %cst_7 : f32 to vector<24x384xf32>
    %15 = arith.maximumf %13, %14 : vector<24x384xf32>
    %16 = arith.mulf %2, %15 : vector<24x384xf32>
    %17 = arith.truncf %16 : vector<24x384xf32> to vector<24x384xbf16>
    %c0_8 = arith.constant 0 : index
    %c0_9 = arith.constant 0 : index
    %18 = vector.load %arg4[%c0_8, %c0_9] : memref<384x256xbf16, #tpu.memory_space<vmem>>, vector<384x256xbf16>
    %cst_10 = arith.constant dense<0.000000e+00> : vector<24x256xf32>
    %19 = tpu.matmul %17, %18, %cst_10 {dimension_numbers = #tpu.dot_dimension_numbers<[1], [0], [0], [1], [0, 0, 1, 1], [], []>} : vector<24x384xbf16>, vector<384x256xbf16>, vector<24x256xf32> -> vector<24x256xf32>
    %c0_11 = arith.constant 0 : index
    %c0_12 = arith.constant 0 : index
    %20 = vector.load %arg5[%c0_11, %c0_12] : memref<24x256xf32, #tpu.memory_space<vmem>>, vector<24x256xf32>
    tpu.vector_store %arg5[%c0_11, %c0_12], %19 {strides = array<i32>} : memref<24x256xf32, #tpu.memory_space<vmem>>, vector<24x256xf32>,
    return
  }
  func.func @transform_0(%arg0: i32) -> (i32, i32) {
    %c0_i32 = arith.constant 0 : i32
    %c0_i32_0 = arith.constant 0 : i32
    return %arg0, %c0_i32 : i32, i32
  }
  func.func @transform_1(%arg0: i32) -> (i32, i32) {
    %c0_i32 = arith.constant 0 : i32
    %c0_i32_0 = arith.constant 0 : i32
    %c0_i32_1 = arith.constant 0 : i32
    return %c0_i32, %c0_i32_0 : i32, i32
  }
  func.func @transform_2(%arg0: i32) -> (i32, i32) {
    %c0_i32 = arith.constant 0 : i32
    %c0_i32_0 = arith.constant 0 : i32
    %c0_i32_1 = arith.constant 0 : i32
    return %c0_i32, %c0_i32_0 : i32, i32
  }
  func.func @transform_3(%arg0: i32) -> (i32, i32) {
    %c0_i32 = arith.constant 0 : i32
    %c0_i32_0 = arith.constant 0 : i32
    %c0_i32_1 = arith.constant 0 : i32
    return %c0_i32, %c0_i32_0 : i32, i32
  }
  func.func @transform_4(%arg0: i32) -> (i32, i32) {
    %c0_i32 = arith.constant 0 : i32
    %c0_i32_0 = arith.constant 0 : i32
    return %arg0, %c0_i32 : i32, i32
  }
}

</mosaic_0001>

<bundles_post_ra>
// kernel: tpu_custom_call.1
= control target key start
LH: loop header
LB: loop body
LE: loop exit
PB: predicated region body
PF: predicated region fallthrough
CT: control target
= control target key end

     0   :  { %9 = vsyncpa [#allocation3], 0  ;;  %s2270_s0 = inlined_call_operand.hbm [shape: bf16[48,256], index: 0, kind: input, shape index: {}]   ;;  %s2271_s1 = inlined_call_operand.hbm [shape: bf16[256,384], index: 1, kind: input, shape index: {}]   ;;  %s2272_s2 = inlined_call_operand.vmem [shape: f32[1,384], index: 2, kind: input, shape index: {}]   ;;  %s2273_s3 = inlined_call_operand.hbm [shape: bf16[384,256], index: 3, kind: input, shape index: {}]   ;;  %s2274_s4 = inlined_call_operand.hbm [shape: f32[48,256], index: 4, kind: output, shape index: {}]  }
   0x1   :  { %11 = vsyncpa [#allocation3 + $0x1], 0 }
   0x2   :  { %12 = vsyncpa [#allocation6], 0 }
   0x3   :  { %13 = vsyncpa [#allocation4], 0 }
   0x4   :  { %15 = vsyncpa [#allocation4 + $0x1], 0  ;;  %s1904_s15 = smov 0   ;;  %s1906_s16 = smov 0  }
   0x5   :  { %s1908_s17 = smov 0   ;;  %s1910_s18 = smov 0  }
   0x6 LB: > { %s1925_s19 = sadd.s32 4294967295, %s1865_s18   ;;  %s1316_s20 = sadd.s32 4294967294, %s1865_s18   ;;  %s1865_s18 = sphi %s1910_s18, %s2294_s18   ;;  %s1861_s17 = sphi %s1908_s17, %s2293_s17   ;;  %s1857_s16 = sphi %s1906_s16, %s2292_s16   ;;  %s1853_s15 = sphi %s1904_s15, %s2291_s15  }
   0x7   : > { %p41_p0 = scmp.ne.s32.totalorder %s1857_s16, %s1853_s15  ;;  %p2275_p1 = scmp.eq.s32.totalorder %s1925_s19, 0 }
   0x8   : > { %p134_p3 = scmp.eq.s32.totalorder %s1316_s20, 1  ;;  %p1317_p5 = scmp.ge.s32.totalorder %s1865_s18, 1 }
   0x9   : > { %p1934_p4 = por %p2275_p1, %p41_p0  ;;  %p141_p7 = scmp.lt.s32.totalorder %s1865_s18, 3 }
   0xa   : > { %p1939_p6 = por %p134_p3, %p41_p0  ;;  %s1867_s24 = smov [#allocation5]  }
   0xb   : > { %s2278_s21 = scalar_select %p1934_p4, 1, 0 }
   0xc   : > { %s2279_s22 = scalar_select %p1939_p6, 1, 0 }
   0xd   : > { %p1944_p8 = pnand %p1317_p5, %p141_p7  ;;  %s153_s25 = sshll.u32 %s1867_s24, 4  ;;  %s1948_s25 = int_to_ptr.vmem [resolvable:$true] %s153_s25 }
   0xe   : > { %s1868_s27 = smov [#allocation7]   ;;  %s1709_s5 = scalar_lea.hbm %s2271_s1, 6144 }
   0xf   : > { %p1487_p9 = pneg %p1944_p8  ;;  %s169_s28 = sshll.u32 %s1868_s27, 4  ;;  %s1959_s28 = int_to_ptr.vmem [resolvable:$true] %s169_s28 }
  0x10   : > { %p1710_p12 = scmp.ne.s32.totalorder %s2271_s1, %s1709_s5  ;;  %p1716_p5 = scmp.lt.u32.totalorder %s1709_s5, %s2271_s1 }
  0x11   : > { %p1955_p11 = pnand %p1487_p9, %p2275_p1 }
  0x13   : > { %p1711_p13 = pneg %p1955_p11 }
  0x15   : > { %p1712_p0 = pnand %p1711_p13, %p1710_p12 }
  0x17   : > { %p1713_p3 = pneg %p1712_p0 }
  0x19   : > { %p1718_p7 = pnand %p1716_p5, %p1713_p3 }
  0x1b   : > { %1721 = shalt.err (!%p1718_p7)
}
  0x1c   : > { %s1722_s10 = scalar_lea.vmem %s1948_s25, 6144  ;;  %p1730_p2 = scmp.lt.s32.totalorder %s1948_s25, %s1948_s25 }
  0x1d   : > { %p1723_p9 = scmp.ne.s32.totalorder %s1948_s25, %s1722_s10  ;;  %p1731_p12 = scmp.lt.s32.totalorder %s1722_s10, %s1722_s10 }
  0x1f   : > { %p1725_p10 = pnand %p1723_p9, %p1711_p13  ;;  %p1732_p0 = por %p1731_p12, %p1730_p2 }
  0x21   : > { %p1726_p1 = pneg %p1725_p10 }
  0x23   : > { %p1733_p6 = pnand %p1732_p0, %p1726_p1 }
  0x25   : > { %1736 = shalt.err (!%p1733_p6)
}
  0x26   : > { %s1869_s11 = smov 192   ;;  %s1870_s12 = smov 12  }
  0x27   : > { %1490 = dma.hbm_to_vmem [thread:$0]  (!%p1955_p11), %s2271_s1, 6144, %s1948_s25, [#allocation6], %s1869_s11, %s1869_s11, %s1870_s12  }
  0x28   : > { %s1737_s27 = scalar_lea.hbm %s2273_s3, 6144 }
  0x29   : > { %p1738_p2 = scmp.ne.s32.totalorder %s2273_s3, %s1737_s27  ;;  %p1744_p10 = scmp.lt.u32.totalorder %s1737_s27, %s2273_s3 }
  0x2b   : > { %p1740_p1 = pnand %p1738_p2, %p1711_p13 }
  0x2d   : > { %p1741_p6 = pneg %p1740_p1 }
  0x2f   : > { %p1746_p3 = pnand %p1744_p10, %p1741_p6 }
  0x31   : > { %1749 = shalt.err (!%p1746_p3)
}
  0x32   : > { %s1750_s25 = scalar_lea.vmem %s1959_s28, 6144  ;;  %p1758_p12 = scmp.lt.s32.totalorder %s1959_s28, %s1959_s28 }
  0x33   : > { %p1751_p5 = scmp.ne.s32.totalorder %s1959_s28, %s1750_s25  ;;  %p1759_p0 = scmp.lt.s32.totalorder %s1750_s25, %s1750_s25 }
  0x35   : > { %p1753_p7 = pnand %p1751_p5, %p1711_p13  ;;  %p1760_p2 = por %p1759_p0, %p1758_p12 }
  0x37   : > { %p1754_p9 = pneg %p1753_p7 }
  0x39   : > { %p1761_p1 = pnand %p1760_p2, %p1754_p9 }
  0x3b   : > { %1764 = shalt.err (!%p1761_p1)
}
  0x3c   : > { %s1871_s7 = smov 128   ;;  %s1872_s8 = smov 8  }
  0x3d   : > { %1493 = dma.hbm_to_vmem [thread:$0]  (!%p1955_p11), %s2273_s3, 6144, %s1959_s28, [#allocation6], %s1871_s7, %s1871_s7, %s1872_s8  }
  0x3e   : > { %s2017_s11 = sadd.s32 1, %s1865_s18   ;;  %s28_s13 = sadd.s32 1, %s1861_s17 }
  0x3f   : > { %s25_s12 = ssub.s32 %s1865_s18, %s2017_s11  ;;  %p35_p6 = scmp.ne.s32.totalorder %s1861_s17, %s1857_s16 }
  0x40   : > { %p26_p13 = scmp.eq.s32.totalorder %s25_s12, 0  ;;  %p36_p10 = scmp.eq.s32.totalorder %s1865_s18, 0 }
  0x41   : > { %p2282_p5 = scmp.eq.s32.totalorder %s1925_s19, 1  ;;  %p1504_p9 = scmp.lt.s32.totalorder %s1865_s18, 2 }
  0x42   : > { %s2026_s14 = scalar_select %p26_p13, %s1861_s17, %s28_s13  }
  0x43   : > { %p37_p3 = por %p36_p10, %p35_p6  ;;  %p2030_p7 = por %p2282_p5, %p35_p6 }
  0x44   : > { %s183_s20 = sand.u32 1, %s1861_s17   ;;  %s1434_s28 = smul.u32 384, %s1865_s18 }
  0x45   : > { %s2283_s26 = scalar_select %p2030_p7, 1, 0 }
  0x46   : > { %s1472_s24 = smul.u32 24, %s183_s20  ;;  %p2037_p11 = pnand %p1504_p9, %p37_p3 }
  0x47   : > { %s2044_s5 = scalar_lea.hbm %s2270_s0, %s1434_s28  ;;  %s2048_s9 = scalar_lea.sflag [#allocation3], %s183_s20 }
  0x48   : > { %s187_s6 = scalar_lea.vmem [#allocation2], %s1472_s24  ;;  %s1765_s10 = scalar_lea.hbm %s2044_s5, 384 }
  0x49   : > { %s195_s25 = sshll.u32 %s187_s6, 4  ;;  %p1766_p12 = scmp.ne.s32.totalorder %s2044_s5, %s1765_s10  ;;  %s2046_s25 = int_to_ptr.vmem [resolvable:$true] %s195_s25 }
  0x4a   : > { %p1767_p0 = pneg %p2037_p11  ;;  %s1770_s28 = scalar_lea.hbm %s2270_s0, 768 }
  0x4b   : > { %p1771_p13 = scmp.lt.u32.totalorder %s2044_s5, %s2270_s0  ;;  %p1772_p6 = scmp.lt.u32.totalorder %s1770_s28, %s1765_s10 }
  0x4c   : > { %p1768_p2 = pnand %p1767_p0, %p1766_p12  ;;  %p1774_p3 = scmp.lt.u32.totalorder %s1765_s10, %s2044_s5 }
  0x4d   : > { %p1773_p10 = por %p1772_p6, %p1771_p13 }
  0x4e   : > { %p1769_p1 = pneg %p1768_p2 }
  0x4f   : > { %p1775_p5 = por %p1774_p3, %p1773_p10 }
  0x51   : > { %p1776_p9 = pnand %p1775_p5, %p1769_p1 }
  0x53   : > { %1779 = shalt.err (!%p1776_p9)
}
  0x54   : > { %s1780_s20 = scalar_lea.vmem %s2046_s25, 384  ;;  %s1873_s24 = smov [#allocation2]  }
  0x55   : > { %p1781_p12 = scmp.ne.s32.totalorder %s2046_s25, %s1780_s20  ;;  %s1785_s6 = sshll.u32 %s1873_s24, 4  ;;  %s1786_s6 = int_to_ptr.vmem [resolvable:$false] %s1785_s6 }
  0x56   : > { %s1787_s12 = scalar_lea.vmem %s1786_s6, 768  ;;  %p1788_p4 = scmp.lt.s32.totalorder %s2046_s25, %s1786_s6 }
  0x57   : > { %p1783_p2 = pnand %p1781_p12, %p1767_p0  ;;  %p1789_p13 = scmp.lt.s32.totalorder %s1787_s12, %s1780_s20 }
  0x59   : > { %p1784_p7 = pneg %p1783_p2  ;;  %p1790_p6 = por %p1789_p13, %p1788_p4 }
  0x5b   : > { %p1791_p10 = pnand %p1790_p6, %p1784_p7 }
  0x5d   : > { %1794 = shalt.err (!%p1791_p10)
}
  0x5e   : > { %1497 = dma.hbm_to_vmem [thread:$0]  (!%p2037_p11), %s2044_s5, 384, %s2046_s25, %s2048_s9, %s1871_s7, %s1871_s7, %s1872_s8  }
  0x5f   : > { %207 = sbr.rel (%p1944_p8) target bundleno = 838 (0x346), region = 36  ;;  %s2082_s10 = sand.u32 (!%p1944_p8), 1, %s1857_s16  }
  0x60   : > { %s1473_s13 = smul.u32 (!%p1944_p8), 24, %s2082_s10  ;;  %s210_s28 = scalar_lea.sflag (!%p1944_p8), [#allocation3], %s2082_s10 }
  0x61   : > { %p2285_p4 = scmp.ne.s32.totalorder (!%p1944_p8), %s2278_s21, 0 }
  0x62   : > { %s2086_s29 = scalar_lea.vmem (!%p1944_p8), [#allocation2], %s1473_s13 }
  0x66   : > { %1840 = dma.done.wait (%p2285_p4), %s210_s28, 384  }
  0x67   : > { %1842 = vsyncadd (%p2285_p4), %s210_s28, 4294966912  ;;  %p2286_p7 = scmp.eq.s32.totalorder %s1925_s19, 0 }
  0x69   : > { %1844 = dma.done.wait (%p2286_p7), [#allocation6], 12288   ;;  %p2287_p8 = pmov %p2286_p7 }
  0x6a   : > { %v1550_v0 = vld [vmem:[#allocation5 + $0x4] ss:$12 sps:$4 sm:$0xff]   ;;  %v1552_v1 = vld [vmem:[#allocation5] ss:$12 sps:$4 sm:$0xff]   ;;  %v1553_v2 = vld [vmem:[#allocation5 + $0x1c] ss:$12 sps:$4 sm:$0xff]  }
  0x6b   : > { %1846 = vsyncadd (%p2287_p8), [#allocation6], 4294955008  ;;  %589 = vmatprep.subr.bf16.mxu0 %v1550_v0  ;;  %v1555_v3 = vld [vmem:[#allocation5 + $0x18] ss:$12 sps:$4 sm:$0xff]   ;;  %v1556_v4 = vld [vmem:[#allocation5 + $0x34] ss:$12 sps:$4 sm:$0xff]  }
  0x6c   : > { %590 = vmatpush1.bf16.msra.mxu0 %v1552_v1  ;;  %v1558_v5 = vld [vmem:[#allocation5 + $0x30] ss:$12 sps:$4 sm:$0xff]   ;;  %v1559_v6 = vld [vmem:[#allocation5 + $0x4c] ss:$12 sps:$4 sm:$0xff]   ;;  %v1561_v7 = vld [vmem:[#allocation5 + $0x48] ss:$12 sps:$4 sm:$0xff]  }
  0x6d   : > { %591 = vmatprep.subr.bf16.mxu0 %v1553_v2  ;;  %v1562_v8 = vld [vmem:[#allocation5 + $0x64] ss:$12 sps:$4 sm:$0xff]   ;;  %v1564_v9 = vld [vmem:[#allocation5 + $0x60] ss:$12 sps:$4 sm:$0xff]   ;;  %v1565_v10 = vld [vmem:[#allocation5 + $0x7c] ss:$12 sps:$4 sm:$0xff]  }
  0x6e   : > { %v1567_v11 = vld [vmem:[#allocation5 + $0x78] ss:$12 sps:$4 sm:$0xff]   ;;  %v1568_v12 = vld [vmem:[#allocation5 + $0x94] ss:$12 sps:$4 sm:$0xff]   ;;  %v1570_v14 = vld [vmem:[#allocation5 + $0x90] ss:$12 sps:$4 sm:$0xff]  }
  0x6f   : > { %v1600_v13 = vld [vmem:[%s2086_s29 + $0x4] ss:$8 sps:$4 sm:$0xff]   ;;  %v1574_v17 = vld [vmem:[#allocation5 + $0xc4] ss:$12 sps:$4 sm:$0xff]   ;;  %v1621_v54 = vld [vmem:[#allocation7] ss:$8 sps:$4 sm:$0xff]  }
  0x70   : > { %592 = vmatpush1.bf16.msra.mxu0 %v1555_v3  ;;  %v1571_v15 = vld [vmem:[#allocation5 + $0xac] ss:$12 sps:$4 sm:$0xff]   ;;  %621 = vmatprep.mubr.bf16.mxu0 %v1600_v13  ;;  %v1573_v16 = vld [vmem:[#allocation5 + $0xa8] ss:$12 sps:$4 sm:$0xff]   ;;  %v1582_v22 = vld [vmem:[#allocation5 + $0xf0] ss:$12 sps:$4 sm:$0xff]  }
  0x71   : > { %593 = vmatprep.subr.bf16.mxu0 %v1556_v4  ;;  %v1576_v18 = vld [vmem:[#allocation5 + $0xc0] ss:$12 sps:$4 sm:$0xff]   ;;  %v1577_v19 = vld [vmem:[#allocation5 + $0xdc] ss:$12 sps:$4 sm:$0xff]   ;;  %v1579_v20 = vld [vmem:[#allocation5 + $0xd8] ss:$12 sps:$4 sm:$0xff]  }
  0x72   : > { %v1580_v21 = vld [vmem:[#allocation5 + $0xf4] ss:$12 sps:$4 sm:$0xff]   ;;  %v1583_v23 = vld [vmem:[#allocation5 + $0x10c] ss:$12 sps:$4 sm:$0xff]   ;;  %v1586_v25 = vld [vmem:[#allocation5 + $0x124] ss:$12 sps:$4 sm:$0xff]  }
  0x73   : > { %v1585_v24 = vld [vmem:[#allocation5 + $0x108] ss:$12 sps:$4 sm:$0xff]   ;;  %v1588_v26 = vld [vmem:[#allocation5 + $0x120] ss:$12 sps:$4 sm:$0xff]   ;;  %v1591_v28 = vld [vmem:[#allocation5 + $0x138] ss:$12 sps:$4 sm:$0xff]  }
  0x74   : > { %594 = vmatpush1.bf16.msra.mxu0 %v1558_v5  ;;  %v1589_v27 = vld [vmem:[#allocation5 + $0x13c] ss:$12 sps:$4 sm:$0xff]   ;;  %v1592_v29 = vld [vmem:[#allocation5 + $0x154] ss:$12 sps:$4 sm:$0xff]   ;;  %v1595_v31 = vld [vmem:[#allocation5 + $0x16c] ss:$12 sps:$4 sm:$0xff]  }
  0x75   : > { %595 = vmatprep.subr.bf16.mxu0 %v1559_v6  ;;  %v1594_v30 = vld [vmem:[#allocation5 + $0x150] ss:$12 sps:$4 sm:$0xff]   ;;  %v1597_v32 = vld [vmem:[#allocation5 + $0x168] ss:$12 sps:$4 sm:$0xff]   ;;  %v1603_v38 = vld [vmem:[#allocation5 + $0xe0] ss:$12 sps:$4 sm:$0xff]  }
  0x76   : > { %v1601_v33 = vld [vmem:[#allocation5 + $0xc8] ss:$12 sps:$4 sm:$0xff]   ;;  %v251_v34 = vld [vmem:[%s2086_s29 + $0x10] sm:$0xff]  ;;  %s1874_s21 = smov 64   ;;  %s1474_s8 = smul.u32 48, %s2082_s10 }
  0x77   : > { %v1598_v35 = vld [vmem:[%s2086_s29] ss:$8 sps:$4 sm:$0xff]   ;;  %v1329_v37 = vcombine.high %v251_v34, %v251_v34  ;;  %v1604_v39 = vld [vmem:[#allocation5 + $0x20] ss:$12 sps:$4 sm:$0xff]   ;;  %v1328_v41 = vcombine.low %v251_v34, %v251_v34  ;;  %v1622_v55 = vld [vmem:[#allocation7 + $0x14] ss:$8 sps:$4 sm:$0xff]  }
  0x78   : > { %596 = vmatpush1.bf16.msra.mxu0 %v1561_v7  ;;  %v1602_v36 = vld [vmem:[#allocation5 + $0x8] ss:$12 sps:$4 sm:$0xff]   ;;  %v1605_v40 = vld [vmem:[#allocation5 + $0xf8] ss:$12 sps:$4 sm:$0xff]   ;;  %v1609_v43 = vld [vmem:[#allocation5 + $0x110] ss:$12 sps:$4 sm:$0xff]  }
  0x79   : > { %597 = vmatprep.subr.bf16.mxu0 %v1562_v8  ;;  %v1606_v42 = vld [vmem:[#allocation5 + $0x38] ss:$12 sps:$4 sm:$0xff]   ;;  %v1610_v44 = vld [vmem:[#allocation5 + $0x50] ss:$12 sps:$4 sm:$0xff]   ;;  %v1611_v45 = vld [vmem:[#allocation5 + $0x128] ss:$12 sps:$4 sm:$0xff]  }
  0x7a   : > { %v1612_v46 = vld [vmem:[#allocation5 + $0x68] ss:$12 sps:$4 sm:$0xff]   ;;  %v1613_v47 = vld [vmem:[#allocation5 + $0x140] ss:$12 sps:$4 sm:$0xff]   ;;  %v1615_v49 = vld [vmem:[#allocation5 + $0x158] ss:$12 sps:$4 sm:$0xff]  }
  0x7b   : > { %v1614_v48 = vld [vmem:[#allocation5 + $0x80] ss:$12 sps:$4 sm:$0xff]   ;;  %v1616_v50 = vld [vmem:[#allocation5 + $0x98] ss:$12 sps:$4 sm:$0xff]   ;;  %v1617_v51 = vld [vmem:[#allocation5 + $0x170] ss:$12 sps:$4 sm:$0xff]  }
  0x7c   : > { %598 = vmatpush1.bf16.msra.mxu0 %v1564_v9  ;;  %v1618_v52 = vld [vmem:[#allocation5 + $0xb0] ss:$12 sps:$4 sm:$0xff]   ;;  %v1619_v53 = vld [vmem:[#allocation7 + $0x4] ss:$8 sps:$4 sm:$0xff]   ;;  %v1627_v61 = vld [vmem:[#allocation7 + $0x20] ss:$8 sps:$4 sm:$0xff]  }
  0x7d   : > { %599 = vmatprep.subr.bf16.mxu0 %v1565_v10  ;;  %1101 = vmatprep.subr.bf16.mxu1 %v1619_v53  ;;  %v1624_v56 = vld [vmem:[#allocation7 + $0x10] ss:$8 sps:$4 sm:$0xff]   ;;  %v1625_v58 = vld [vmem:[#allocation7 + $0x24] ss:$8 sps:$4 sm:$0xff]   ;;  %v1628_v0 = vld [vmem:[#allocation7 + $0x34] ss:$8 sps:$4 sm:$0xff]  }
  0x7e   : > { %1102 = vmatpush1.bf16.msra.mxu1 %v1621_v54  ;;  %v1630_v2 = vld [vmem:[#allocation7 + $0x30] ss:$8 sps:$4 sm:$0xff]   ;;  %v1631_v4 = vld [vmem:[#allocation7 + $0x44] ss:$8 sps:$4 sm:$0xff]   ;;  %v1633_v7 = vld [vmem:[#allocation7 + $0x40] ss:$8 sps:$4 sm:$0xff]  }
  0x7f   : > { %1103 = vmatprep.subr.bf16.mxu1 %v1622_v55  ;;  %s245_s27 = scalar_lea.vmem [#allocation8], %s1474_s8  ;;  %s1435_s25 = smul.u32 768, %s1925_s19 }
  0x80   : > { %600 = vmatpush1.bf16.msra.mxu0 %v1567_v11  ;;  %v1634_v11 = vld [vmem:[#allocation7 + $0x54] ss:$8 sps:$4 sm:$0xff]   ;;  %s1224_s5 = sshll.u32 %s245_s27, 4  ;;  %s1210_s24 = scalar_lea.sflag [#allocation4], %s2082_s10  ;;  %s2221_s5 = int_to_ptr.vmem [resolvable:$true] %s1224_s5 }
  0x81   : > { %601 = vmatprep.subr.bf16.mxu0 %v1568_v12  ;;  %v1636_v12 = vld [vmem:[#allocation7 + $0x50] ss:$8 sps:$4 sm:$0xff]   ;;  %s2226_s20 = scalar_lea.hbm %s2274_s4, %s1435_s25  ;;  %s1795_s6 = scalar_lea.vmem %s2221_s5, 768 }
  0x82   : > { %1104 = vmatpush1.bf16.msra.mxu1 %v1624_v56  ;;  %p1796_p11 = scmp.ne.s32.totalorder %s2221_s5, %s1795_s6  ;;  %p2288_p0 = scmp.ne.s32.totalorder %s2283_s26, 0 }
  0x83   : > { %1105 = vmatprep.subr.bf16.mxu1 %v1625_v58  ;;  %s1876_s19 = smov [#allocation8]  }
  0x84   : > { %602 = vmatpush1.bf16.msra.mxu0 %v1570_v14  ;;  %p1797_p1 = pnand %p1796_p11, %p2288_p0  ;;  %s1799_s12 = sshll.u32 %s1876_s19, 4  ;;  %s1800_s12 = int_to_ptr.vmem [resolvable:$false] %s1799_s12 }
  0x85   : > { %603 = vmatprep.subr.bf16.mxu0 %v1571_v15  ;;  %v1639_v15 = vld [vmem:[#allocation7 + $0x60] ss:$8 sps:$4 sm:$0xff]   ;;  %s1801_s13 = scalar_lea.vmem %s1800_s12, 1536  ;;  %p1802_p5 = scmp.lt.s32.totalorder %s2221_s5, %s1800_s12 }
  0x86   : > { %1106 = vmatpush1.bf16.msra.mxu1 %v1627_v61  ;;  %p1798_p3 = pneg %p1797_p1  ;;  %p1803_p9 = scmp.lt.s32.totalorder %s1801_s13, %s1795_s6 }
  0x87   : > { %1107 = vmatprep.subr.bf16.mxu1 %v1628_v0 }
  0x88   : > { %604 = vmatpush1.bf16.msra.mxu0 %v1573_v16  ;;  %v1640_v16 = vld [vmem:[#allocation7 + $0x74] ss:$8 sps:$4 sm:$0xff]   ;;  %p1804_p12 = por %p1803_p9, %p1802_p5 }
  0x89   : > { %605 = vmatprep.subr.bf16.mxu0 %v1574_v17  ;;  %v1642_v17 = vld [vmem:[#allocation7 + $0x70] ss:$8 sps:$4 sm:$0xff]  }
  0x8a   : > { %1108 = vmatpush1.bf16.msra.mxu1 %v1630_v2  ;;  %p1805_p2 = pnand %p1804_p12, %p1798_p3 }
  0x8b   : > { %1109 = vmatprep.subr.bf16.mxu1 %v1631_v4 }
  0x8c   : > { %606 = vmatpush1.bf16.msra.mxu0 %v1576_v18  ;;  %v1643_v18 = vld [vmem:[#allocation7 + $0x84] ss:$8 sps:$4 sm:$0xff]  }
  0x8d   : > { %607 = vmatprep.subr.bf16.mxu0 %v1577_v19  ;;  %v1645_v19 = vld [vmem:[#allocation7 + $0x80] ss:$8 sps:$4 sm:$0xff]  }
  0x8e   : > { %1110 = vmatpush1.bf16.msra.mxu1 %v1633_v7 }
  0x8f   : > { %1111 = vmatprep.subr.bf16.mxu1 %v1634_v11 }
  0x90   : > { %608 = vmatpush1.bf16.msra.mxu0 %v1579_v20  ;;  %v1646_v20 = vld [vmem:[#allocation7 + $0x94] ss:$8 sps:$4 sm:$0xff]  }
  0x91   : > { %609 = vmatprep.subr.bf16.mxu0 %v1580_v21  ;;  %v1648_v21 = vld [vmem:[#allocation7 + $0x90] ss:$8 sps:$4 sm:$0xff]  }
  0x92   : > { %1112 = vmatpush1.bf16.msra.mxu1 %v1636_v12 }
  0x94   : > { %610 = vmatpush1.bf16.msra.mxu0 %v1582_v22 }
  0x95   : > { %611 = vmatprep.subr.bf16.mxu0 %v1583_v23 }
  0x98   : > { %612 = vmatpush1.bf16.msra.mxu0 %v1585_v24  ;;  %v1649_v24 = vld [vmem:[#allocation7 + $0xa4] ss:$8 sps:$4 sm:$0xff]  }
  0x99   : > { %613 = vmatprep.subr.bf16.mxu0 %v1586_v25 }
  0x9c   : > { %614 = vmatpush1.bf16.msra.mxu0 %v1588_v26 }
  0x9d   : > { %615 = vmatprep.subr.bf16.mxu0 %v1589_v27  ;;  %v1651_v27 = vld [vmem:[#allocation7 + $0xa0] ss:$8 sps:$4 sm:$0xff]  }
  0xa0   : > { %616 = vmatpush1.bf16.msra.mxu0 %v1591_v28 }
  0xa1   : > { %617 = vmatprep.subr.bf16.mxu0 %v1592_v29 }
  0xa4   : > { %618 = vmatpush1.bf16.msra.mxu0 %v1594_v30 }
  0xa5   : > { %619 = vmatprep.subr.bf16.mxu0 %v1595_v31  ;;  %v1652_v31 = vld [vmem:[#allocation7 + $0xb4] ss:$8 sps:$4 sm:$0xff]  }
  0xa8   : > { %620 = vmatpush1.bf16.msra.mxu0 %v1597_v32  ;;  %v1654_v32 = vld [vmem:[#allocation7 + $0xb0] ss:$8 sps:$4 sm:$0xff]  }
  0xa9   : > { %1436 = vmatprep.subr.bf16.mxu0 %v1601_v33 }
  0xab   : > { %622 = vmatmul.mubr.bf16.vlgmr.msra.gmra.mrb[0].mxu0 %v1598_v35 }
  0xac   : > { %1437 = vmatpush3.bf16.msra.mxu0 %v1602_v36  ;;  %631 = vmatprep.mubr.bf16.mxu0 %v1329_v37  ;;  %v1655_v36 = vld [vmem:[#allocation7 + $0xc4] ss:$8 sps:$4 sm:$0xff]  }
  0xad   : > { %1438 = vmatprep.subr.bf16.mxu0 %v1603_v38 }
  0xb0   : > { %1439 = vmatpush3.bf16.msra.mxu0 %v1604_v39  ;;  %v1657_v39 = vld [vmem:[#allocation7 + $0xc0] ss:$8 sps:$4 sm:$0xff]  }
  0xb1   : > { %1440 = vmatprep.subr.bf16.mxu0 %v1605_v40 }
  0xb3   : > { %632 = vmatmul.mubr.bf16.gmra.mrb[4].mxu0 %v1328_v41 }
  0xb4   : > { %1441 = vmatpush3.bf16.msra.mxu0 %v1606_v42  ;;  %672 = vmatprep.mubr.bf16.mxu0 %v1600_v13  ;;  %v1637_v13 = vld [vmem:[#allocation7 + $0x64] ss:$8 sps:$4 sm:$0xff]  }
  0xb5   : > { %1442 = vmatprep.subr.bf16.mxu0 %v1609_v43  ;;  %1113 = vmatprep.subr.bf16.mxu1 %v1637_v13  ;;  %v1660_v43 = vld [vmem:[#allocation7 + $0xd0] ss:$8 sps:$4 sm:$0xff]  }
  0xb6   : > { %1114 = vmatpush1.bf16.msra.mxu1 %v1639_v15 }
  0xb7   : > { %1115 = vmatprep.subr.bf16.mxu1 %v1640_v16 }
  0xb8   : > { %1443 = vmatpush3.bf16.msra.mxu0 %v1610_v44  ;;  %v1661_v44 = vld [vmem:[#allocation7 + $0xe4] ss:$8 sps:$4 sm:$0xff]  }
  0xb9   : > { %1444 = vmatprep.subr.bf16.mxu0 %v1611_v45 }
  0xba   : > { %1116 = vmatpush1.bf16.msra.mxu1 %v1642_v17 }
  0xbb   : > { %1117 = vmatprep.subr.bf16.mxu1 %v1643_v18 }
  0xbc   : > { %1445 = vmatpush3.bf16.msra.mxu0 %v1612_v46  ;;  %v1663_v46 = vld [vmem:[#allocation7 + $0xe0] ss:$8 sps:$4 sm:$0xff]  }
  0xbd   : > { %1446 = vmatprep.subr.bf16.mxu0 %v1613_v47  ;;  %v1664_v47 = vld [vmem:[#allocation7 + $0xf4] ss:$8 sps:$4 sm:$0xff]  }
  0xbe   : > { %1118 = vmatpush1.bf16.msra.mxu1 %v1645_v19 }
  0xbf   : > { %1119 = vmatprep.subr.bf16.mxu1 %v1646_v20 }
  0xc0   : > { %1447 = vmatpush3.bf16.msra.mxu0 %v1614_v48  ;;  %v1666_v48 = vld [vmem:[#allocation7 + $0xf0] ss:$8 sps:$4 sm:$0xff]  }
  0xc1   : > { %1448 = vmatprep.subr.bf16.mxu0 %v1615_v49  ;;  %v1669_v49 = vld [vmem:[#allocation7 + $0x104] ss:$8 sps:$4 sm:$0xff]  }
  0xc2   : > { %1120 = vmatpush1.bf16.msra.mxu1 %v1648_v21 }
  0xc3   : > { %1121 = vmatprep.subr.bf16.mxu1 %v1649_v24 }
  0xc4   : > { %1449 = vmatpush3.bf16.msra.mxu0 %v1616_v50 }
  0xc5   : > { %1450 = vmatprep.subr.bf16.mxu0 %v1617_v51  ;;  %v715_v51 = vlaneseq }
  0xc6   : > { %1122 = vmatpush1.bf16.msra.mxu1 %v1651_v27 }
  0xc7   : > { %1123 = vmatprep.subr.bf16.mxu1 %v1652_v31  ;;  %v2168_v53 = vand.u32 127, %v715_v51  ;;  %v2179_v15 = vshrl.u32 %v715_v51, 7 }
  0xc8   : > { %1451 = vmatpush3.bf16.msra.mxu0 %v1618_v52 }
  0xc9   : > { %vm717_vm0 = vcmp.lt.s32.totalorder %v2168_v53, 64  ;;  %v758_v17 = vsub.s32 0, %v2179_v15 }
  0xca   : > { %1124 = vmatpush1.bf16.msra.mxu1 %v1654_v32 }
  0xcb   : > { %673 = vmatmul.mubr.bf16.vlgmr.msra.gmra.mrb[8].mxu0 %v1598_v35  ;;  %1125 = vmatprep.subr.bf16.mxu1 %v1655_v36 }
  0xcc   : > { %680 = vmatprep.mubr.bf16.mxu0 %v1329_v37 }
  0xce   : > { %1126 = vmatpush1.bf16.msra.mxu1 %v1657_v39 }
  0xd3   : > { %681 = vmatmul.mubr.bf16.gmra.mrb[12].mxu0 %v1328_v41  ;;  %v1658_v41 = vld [vmem:[#allocation7 + $0xd4] ss:$8 sps:$4 sm:$0xff]  }
  0xd4   : > { %1127 = vmatprep.subr.bf16.mxu1 %v1658_v41 }
  0xd5   : > { %1128 = vmatpush1.bf16.msra.mxu1 %v1660_v43 }
  0xd6   : > { %1129 = vmatprep.subr.bf16.mxu1 %v1661_v44 }
  0xd9   : > { %1130 = vmatpush1.bf16.msra.mxu1 %v1663_v46 }
  0xda   : > { %1131 = vmatprep.subr.bf16.mxu1 %v1664_v47 }
  0xdd   : > { %1132 = vmatpush1.bf16.msra.mxu1 %v1666_v48 }
  0xde   : > { %1152 = vmatprep.subr.bf16.mxu1 %v1669_v49 }
 0x17e   : > { %v2099_v57 = vpop.f32.mrb[0].mxu0 }
 0x17f   : > { %v2101_v59 = vpop.f32.mrb[1].mxu0  ;;  %v2105_v60 = vmul.f32 %v2099_v57, %v2099_v57 }
 0x180   : > { %v2107_v62 = vpop.f32.mrb[2].mxu0  ;;  %v2123_v5 = vmul.f32 %v2101_v59, %v2101_v59 }
 0x181   : > { %697 = vrot.lane.b32.xlu0 %v2105_v60, %s1874_s21  ;;  %v2111_v63 = vpop.f32.mrb[3].mxu0  ;;  %v2115_v1 = vmul.f32 %v2107_v62, %v2107_v62 }
 0x182   : > { %v692_v42 = vmul.f32 %v2111_v63, %v2111_v63 }
 0x185   : > { %699 = vrot.lane.b32.xlu0 %v2115_v1, %s1874_s21 }
 0x186   : > { %v2119_v3 = vpop.f32.mrb[4].mxu0 }
 0x187   : > { %v2125_v6 = vpop.f32.mrb[5].mxu0  ;;  %v2131_v9 = vmul.f32 %v2119_v3, %v2119_v3 }
 0x188   : > { %v637_v8 = vpop.f32.mrb[6].mxu0  ;;  %v2137_v14 = vmul.f32 %v2125_v6, %v2125_v6 }
 0x189   : > { %703 = vrot.lane.b32.xlu0 %v2123_v5, %s1874_s21  ;;  %v638_v10 = vpop.f32.mrb[7].mxu0 }
 0x18d   : > { %701 = vrot.lane.b32.xlu0 %v2131_v9, %s1874_s21 }
 0x191   : > { %707 = vrot.lane.b32.xlu0 %v2137_v14, %s1874_s21 }
 0x19e   : > { %v1452_v22 = vpop.f32.mrb[8].mxu0 }
 0x19f   : > { %v1453_v23 = vpop.f32.mrb[9].mxu0 }
 0x1a0   : > { %v2141_v25 = vadd.f32 %v1453_v23, %v1452_v22  ;;  %v1455_v26 = vpop.f32.mrb[10].mxu0  ;;  %v2193_v23 = vld [vmem:[%s2272_s2] sm:$0x7] }
 0x1a1   : > { %v1456_v28 = vpop.f32.mrb[11].mxu0  ;;  %v759_v27 = vrot.slane %v2193_v23, %v758_v17  ;;  %v1675_v17 = vld [vmem:[#allocation7 + $0x124] ss:$8 sps:$4 sm:$0xff]  }
 0x1a2   : > { %v2143_v29 = vadd.f32 %v1456_v28, %v1455_v26  ;;  %v2147_v30 = vmul.f32 %v2141_v25, %v2141_v25 }
 0x1a4   : > { %709 = vrot.lane.b32.xlu1 %v2147_v30, %s1874_s21  ;;  %v2153_v33 = vmul.f32 %v2143_v29, %v2143_v29 }
 0x1a6   : > { %v1458_v34 = vpop.f32.mrb[12].mxu0 }
 0x1a7   : > { %v1459_v35 = vpop.f32.mrb[13].mxu0 }
 0x1a8   : > { %711 = vrot.lane.b32.xlu1 %v2153_v33, %s1874_s21  ;;  %v2157_v37 = vadd.f32 %v1459_v35, %v1458_v34  ;;  %v1461_v38 = vpop.f32.mrb[14].mxu0 }
 0x1a9   : > { %v1462_v40 = vpop.f32.mrb[15].mxu0 }
 0x1aa   : > { %v2163_v45 = vmul.f32 %v2157_v37, %v2157_v37 }
 0x1ac   : > { %705 = vrot.lane.b32.xlu1 %v692_v42, %s1874_s21 }
 0x1b0   : > { %713 = vrot.lane.b32.xlu1 %v2163_v45, %s1874_s21 }
 0x1f3   : > { %v698_v50 = vpop.permute.xlu0 %697 }
 0x1f7   : > { %v700_v52 = vpop.permute.xlu0 %699 }
 0x1fb   : > { %v704_v54 = vpop.permute.xlu0 %703 }
 0x1fc   : > { %v721_v47 = vsel %vm717_vm0, %v698_v50, %v704_v54 }
 0x1ff   : > { %v702_v10 = vpop.permute.xlu0 %701 }
 0x203   : > { %v708_v18 = vpop.permute.xlu0 %707 }
 0x216   : > { %v710_v55 = vpop.permute.xlu1 %709 }
 0x217   : > { %v718_v56 = vsel %vm717_vm0, %v704_v54, %v710_v55  ;;  %v724_v58 = vsel %vm717_vm0, %v710_v55, %v698_v50 }
 0x218   : > { %v727_v61 = vadd.f32 %v718_v56, %v2105_v60  ;;  %v728_v0 = vadd.f32 %v724_v58, %v2123_v5  ;;  %v762_v5 = vsub.s32 1, %v2179_v15 }
 0x21a   : > { %v736_v2 = vadd.f32 1e-12, %v727_v61  ;;  %v737_v4 = vadd.f32 1e-12, %v728_v0  ;;  %v712_v7 = vpop.permute.xlu1 %711  ;;  %v763_v26 = vrot.slane %v2193_v23, %v762_v5 }
 0x21b   : > { %v725_v8 = vsel %vm717_vm0, %v712_v7, %v700_v52 }
 0x21c   : > { %1691 = vrsqrt.f32 %v736_v2  ;;  %v731_v11 = vadd.f32 %v725_v8, %v692_v42 }
 0x21d   : > { %1693 = vrsqrt.f32 %v737_v4 }
 0x21e   : > { %v740_v12 = vadd.f32 1e-12, %v731_v11  ;;  %v706_v13 = vpop.permute.xlu1 %705 }
 0x21f   : > { %v719_v16 = vsel %vm717_vm0, %v706_v13, %v712_v7 }
 0x220   : > { %1695 = vrsqrt.f32 %v740_v12  ;;  %v730_v60 = vadd.f32 %v719_v16, %v2115_v1  ;;  %v723_v12 = vsel %vm717_vm0, %v702_v10, %v708_v18 }
 0x222   : > { %v739_v19 = vadd.f32 1e-12, %v730_v60  ;;  %v714_v20 = vpop.permute.xlu1 %713 }
 0x223   : > { %v720_v21 = vsel %vm717_vm0, %v708_v18, %v714_v20  ;;  %v726_v22 = vsel %vm717_vm0, %v714_v20, %v702_v10  ;;  %v1673_v18 = vld [vmem:[#allocation7 + $0x120] ss:$8 sps:$4 sm:$0xff]  }
 0x224   : > { %1697 = vrsqrt.f32 %v739_v19  ;;  %v733_v1 = vadd.f32 %v720_v21, %v2131_v9  ;;  %v734_v24 = vadd.f32 %v726_v22, %v2137_v14  ;;  %v722_v14 = vsel %vm717_vm0, %v700_v52, %v706_v13  ;;  %v1672_v13 = vld [vmem:[#allocation7 + $0x114] ss:$8 sps:$4 sm:$0xff]   ;;  %v1676_v22 = vld [vmem:[#allocation7 + $0x130] ss:$8 sps:$4 sm:$0xff]  }
 0x225   : > { %v732_v58 = vadd.f32 %v722_v14, %v2153_v33  ;;  %v729_v52 = vadd.f32 %v721_v47, %v2147_v30  ;;  %v735_v30 = vadd.f32 %v723_v12, %v2163_v45  ;;  %v1678_v21 = vld [vmem:[#allocation7 + $0x134] ss:$8 sps:$4 sm:$0xff]   ;;  %v766_v45 = vsub.s32 2, %v2179_v15  ;;  %v1682_v15 = vld [vmem:[#allocation7 + $0x150] ss:$8 sps:$4 sm:$0xff]  }
 0x226   : > { %v1692_v28 = vpop.eup %1691  ;;  %v742_v31 = vadd.f32 1e-12, %v733_v1  ;;  %v743_v32 = vadd.f32 1e-12, %v734_v24  ;;  %v1681_v1 = vld [vmem:[#allocation7 + $0x144] ss:$8 sps:$4 sm:$0xff]  }
 0x227   : > { %v1694_v34 = vpop.eup %1693  ;;  %v771_v36 = vmul.f32 %v1692_v28, %v759_v27  ;;  %v741_v54 = vadd.f32 1e-12, %v732_v58  ;;  %v738_v60 = vadd.f32 1e-12, %v729_v52  ;;  %v744_v10 = vadd.f32 1e-12, %v735_v30 }
 0x228   : > { %1699 = vrsqrt.f32 %v742_v31  ;;  %v772_v35 = vmul.f32 %v1694_v34, %v763_v26  ;;  %v767_v24 = vrot.slane %v2193_v23, %v766_v45  ;;  %v1684_v28 = vld [vmem:[#allocation7 + $0x154] ss:$8 sps:$4 sm:$0xff]   ;;  %v1687_v34 = vld [vmem:[#allocation7 + $0x164] ss:$8 sps:$4 sm:$0xff]  }
 0x229   : > { %1701 = vrsqrt.f32 %v743_v32  ;;  %v780_v9 = vsub.f32 1.0, %v771_v36 }
 0x22a   : > { %v1696_v38 = vpop.eup %1695  ;;  %v781_v39 = vsub.f32 1.0, %v772_v35  ;;  %1703 = vrsqrt.f32 %v741_v54 }
 0x22b   : > { %v775_v40 = vmul.f32 %v1696_v38, %v763_v26  ;;  %v789_v55 = vmax.f32 %v780_v9, 0.0  ;;  %1705 = vrsqrt.f32 %v738_v60  ;;  %v1688_v9 = vld [vmem:[#allocation7 + $0x170] ss:$8 sps:$4 sm:$0xff]  }
 0x22c   : > { %v790_v42 = vmax.f32 %v781_v39, 0.0  ;;  %1707 = vrsqrt.f32 %v744_v10  ;;  %v1685_v39 = vld [vmem:[#allocation7 + $0x160] ss:$8 sps:$4 sm:$0xff]  }
 0x22d   : > { %v784_v41 = vsub.f32 1.0, %v775_v40  ;;  %v798_v8 = vmul.f32 %v789_v55, %v2099_v57  ;;  %v1670_v57 = vld [vmem:[#allocation7 + $0x110] ss:$8 sps:$4 sm:$0xff]   ;;  %v1690_v40 = vld [vmem:[#allocation7 + $0x174] ss:$8 sps:$4 sm:$0xff]  }
 0x22e   : > { %v1698_v43 = vpop.eup %1697  ;;  %v799_v48 = vmul.f32 %v790_v42, %v2101_v59 }
 0x22f   : > { %v793_v44 = vmax.f32 %v784_v41, 0.0  ;;  %v774_v46 = vmul.f32 %v1698_v43, %v759_v27 }
 0x231   : > { %v802_v49 = vmul.f32 %v793_v44, %v2111_v63  ;;  %v783_v51 = vsub.f32 1.0, %v774_v46  ;;  %v1667_v63 = vld [vmem:[#allocation7 + $0x100] ss:$8 sps:$4 sm:$0xff]  }
 0x232   : > { %v1700_v56 = vpop.eup %1699 }
 0x233   : > { %v1702_v61 = vpop.eup %1701  ;;  %v808_v0 = vpack.c.bf16 %v802_v49, %v799_v48  ;;  %v792_v2 = vmax.f32 %v783_v51, 0.0  ;;  %v777_v4 = vmul.f32 %v1700_v56, %v759_v27  ;;  %v1679_v27 = vld [vmem:[#allocation7 + $0x140] ss:$8 sps:$4 sm:$0xff]  }
 0x234   : > { %v778_v7 = vmul.f32 %v1702_v61, %v763_v26 }
 0x235   : > { %1133 = vmatprep.mubr.bf16.mxu1 %v808_v0  ;;  %v801_v50 = vmul.f32 %v792_v2, %v2107_v62  ;;  %v786_v59 = vsub.f32 1.0, %v777_v4 }
 0x236   : > { %v787_v11 = vsub.f32 1.0, %v778_v7 }
 0x237   : > { %v807_v33 = vpack.c.bf16 %v801_v50, %v798_v8  ;;  %v795_v16 = vmax.f32 %v786_v59, 0.0 }
 0x238   : > { %v796_v5 = vmax.f32 %v787_v11, 0.0 }
 0x239   : > { %1134 = vmatmul.mubr.bf16.vlgmr.msra.gmra.mrb[0].mxu1 %v807_v33  ;;  %v804_v19 = vmul.f32 %v795_v16, %v2119_v3  ;;  %v1704_v3 = vpop.eup %1703 }
 0x23a   : > { %1153 = vmatpush1.bf16.msra.mxu1 %v1667_v63  ;;  %v805_v62 = vmul.f32 %v796_v5, %v2125_v6  ;;  %v1875_v6 = vmov 0   ;;  %v1706_v26 = vpop.eup %1705  ;;  %v776_v31 = vmul.f32 %v1704_v3, %v767_v24 }
 0x23b   : > { %1154 = vmatprep.subr.bf16.mxu1 %v1672_v13  ;;  %v810_v20 = vpack.c.bf16 %v804_v19, %v804_v19  ;;  %v773_v32 = vmul.f32 %v1706_v26, %v767_v24  ;;  %v1708_v36 = vpop.eup %1707 }
 0x23c   : > { %v811_v53 = vpack.c.bf16 %v805_v62, %v805_v62  ;;  %v785_v35 = vsub.f32 1.0, %v776_v31  ;;  %v779_v23 = vmul.f32 %v1708_v36, %v767_v24 }
 0x23d   : > { %v782_v38 = vsub.f32 1.0, %v773_v32 }
 0x23e   : > { %1143 = vmatprep.mubr.bf16.mxu1 %v811_v53  ;;  %1155 = vmatpush1.bf16.msra.mxu1 %v1670_v57  ;;  %v794_v41 = vmax.f32 %v785_v35, 0.0  ;;  %v788_v14 = vsub.f32 1.0, %v779_v23 }
 0x23f   : > { %1156 = vmatprep.subr.bf16.mxu1 %v1675_v17  ;;  %v791_v42 = vmax.f32 %v782_v38, 0.0 }
 0x240   : > { %v803_v43 = vmul.f32 %v2143_v29, %v794_v41  ;;  %v797_v47 = vmax.f32 %v788_v14, 0.0 }
 0x241   : > { %1144 = vmatmul.mubr.bf16.gmra.mrb[4].mxu1 %v810_v20  ;;  %v800_v44 = vmul.f32 %v2141_v25, %v791_v42 }
 0x242   : > { %1157 = vmatpush1.bf16.msra.mxu1 %v1673_v18  ;;  %1184 = vmatprep.mubr.bf16.mxu1 %v1875_v6  ;;  %v806_v48 = vmul.f32 %v2157_v37, %v797_v47 }
 0x243   : > { %1158 = vmatprep.subr.bf16.mxu1 %v1678_v21  ;;  %v809_v46 = vpack.c.bf16 %v803_v43, %v800_v44 }
 0x244   : > { %v812_v49 = vpack.c.bf16 %v806_v48, %v806_v48 }
 0x246   : > { %1159 = vmatpush1.bf16.msra.mxu1 %v1676_v22 }
 0x247   : > { %1160 = vmatprep.subr.bf16.mxu1 %v1681_v1 }
 0x24a   : > { %1161 = vmatpush1.bf16.msra.mxu1 %v1679_v27 }
 0x24b   : > { %1162 = vmatprep.subr.bf16.mxu1 %v1684_v28 }
 0x24e   : > { %1163 = vmatpush1.bf16.msra.mxu1 %v1682_v15 }
 0x24f   : > { %1164 = vmatprep.subr.bf16.mxu1 %v1687_v34 }
 0x252   : > { %1165 = vmatpush1.bf16.msra.mxu1 %v1685_v39 }
 0x253   : > { %1166 = vmatprep.subr.bf16.mxu1 %v1690_v40 }
 0x256   : > { %1167 = vmatpush1.bf16.msra.mxu1 %v1688_v9 }
 0x259   : > { %1185 = vmatmul.mubr.bf16.vlgmr.msra.gmra.mrb[0].mxu1 %v809_v46 }
 0x25a   : > { %1194 = vmatprep.mubr.bf16.mxu1 %v1875_v6 }
 0x261   : > { %1195 = vmatmul.mubr.bf16.gmra.mrb[4].mxu1 %v812_v49 }
 0x32c   : > { %v1186_v51 = vpop.f32.mrb[0].mxu1 }
 0x32d   : > { %1203 = vst [vmem:[%s245_s27] sm:$0xff] %v1186_v51  ;;  %v1188_v55 = vpop.f32.mrb[1].mxu1 }
 0x32e   : > { %1204 = vst [vmem:[%s245_s27 + $0x8] sm:$0xff] %v1188_v55  ;;  %v1190_v29 = vpop.f32.mrb[2].mxu1 }
 0x32f   : > { %1205 = vst [vmem:[%s245_s27 + $0x10] sm:$0xff] %v1190_v29  ;;  %v1192_v25 = vpop.f32.mrb[3].mxu1 }
 0x330   : > { %1206 = vst [vmem:[%s245_s27 + $0x18] sm:$0xff] %v1192_v25 }
 0x334   : > { %v1196_v37 = vpop.f32.mrb[4].mxu1 }
 0x335   : > { %1207 = vst [vmem:[%s245_s27 + $0x20] sm:$0xff] %v1196_v37  ;;  %v1198_v56 = vpop.f32.mrb[5].mxu1 }
 0x336   : > { %1208 = vst [vmem:[%s245_s27 + $0x28] sm:$0xff] %v1198_v56  ;;  %v1200_v58 = vpop.f32.mrb[6].mxu1 }
 0x337   : > { %v1201_v61 = vpop.f32.mrb[7].mxu1 }
 0x338   : > { %1808 = shalt.err (!%p1805_p2)
}
 0x339   : > { %s1809_s28 = scalar_lea.hbm %s2226_s20, 768  ;;  %s1813_s23 = scalar_lea.hbm %s2274_s4, 1536 }
 0x33a   : > { %p1810_p13 = scmp.ne.s32.totalorder %s2226_s20, %s1809_s28  ;;  %p1814_p4 = scmp.lt.u32.totalorder %s2226_s20, %s2274_s4 }
 0x33b   : > { %p1815_p7 = scmp.lt.u32.totalorder %s1813_s23, %s1809_s28  ;;  %p1817_p11 = scmp.lt.u32.totalorder %s1809_s28, %s2226_s20 }
 0x33c   : > { %p1811_p6 = pnand %p1810_p13, %p2288_p0 }
 0x33d   : > { %p1816_p8 = por %p1815_p7, %p1814_p4 }
 0x33e   : > { %p1812_p10 = pneg %p1811_p6 }
 0x33f   : > { %p1818_p1 = por %p1817_p11, %p1816_p8 }
 0x341   : > { %p1819_p3 = pnand %p1818_p1, %p1812_p10 }
 0x343   : > { %1822 = shalt.err (!%p1819_p3)
}
 0x344   : > { %s1877_s27 = smov 256   ;;  %s1878_s25 = smov 16  }
 0x345   : > { %1485 = dma.vmem_to_hbm [thread:$0]  (%p2288_p0), %s2221_s5, 768, %s2226_s20, %s1210_s24, %s1877_s27, %s1877_s27, %s1878_s25  }
 0x346 PF: > { %s1239_s9 = sand.u32 1, %s1853_s15   ;;  %p2289_p5 = scmp.ne.s32.totalorder %s2279_s22, 0 }
 0x347   : > { %p2290_p9 = scmp.ge.s32.totalorder %s1865_s18, 2  ;;  %s1240_s30 = scalar_lea.sflag [#allocation4], %s1239_s9 }
 0x349   : > { %p1499_p12 = pnand %p2290_p9, %p2289_p5 }
 0x34b   : > { %1848 = dma.done.wait (!%p1499_p12), %s1240_s30, 768  }
 0x34c   : > { %1850 = vsyncadd (!%p1499_p12), %s1240_s30, 4294966528  ;;  %p18_p2 = scmp.ge.s32.totalorder %s2017_s11, 4   ;;  %s2291_s15 = smov %s1857_s16 }
 0x34d   : > { %s2292_s16 = smov %s1861_s17  ;;  %s2293_s17 = smov %s2026_s14 }
 0x34e   : > { %s2294_s18 = smov %s2017_s11  ;;  %20 = sbr.rel (!%p18_p2) target bundleno = 6 (0x6), region = 89 }
 0x355   :  { %1245 = vsyncpa [#allocation3], 1 }
 0x356   :  { %1247 = vsyncpa [#allocation3 + $0x1], 1 }
 0x357   :  { %1248 = vsyncpa [#allocation6], 1 }
 0x358   :  { %1249 = vsyncpa [#allocation4], 1 }
 0x359   :  { %1251 = vsyncpa [#allocation4 + $0x1], 1 }

</bundles_post_ra>
